<compile_context>
chip_gen: v6e
topology: v6e:2x2x1
jax: 0.10.0
libtpu: 0.0.40
codegen_flags: <defaults>
</compile_context>

<pallas_src>
import numpy as np
import jax
import jax.numpy as jnp
from jax.experimental import pallas as pl
from jax.experimental.pallas import tpu as pltpu

# ------------------------- configuration (small shapes) -------------------------
N, C, H, W = 2, 3, 32, 32          # synthetic "diffusion output" images
PROMPT_LEN = 64                    # stand-in for MAX_PROMPT_LENGTH = 512
BLUR_RADIUS = 3                    # TODO(synk): PIL GaussianBlur(radius=20) uses a box-blur
                                   # approximation; this is a true separable Gaussian at a
                                   # radius suited to the small 32x32 test images.
NSFW_THRESHOLD = 0.8
RESIZE_HW = 16                     # stand-in for transforms.Resize((384, 384)) at small scale
LANE_PACK = 4                      # channels padded to 4 -> last dim 4*W = 128 lanes
                                   # (native for v5e's 128-wide MXU; at production W bump to
                                   # 256-wide tiles for v6e/v7x's 2x256x256 MXUs).


def _gaussian_taps(radius: int):
    xs = np.arange(-radius, radius + 1, dtype=np.float64)
    sigma = max(radius / 2.0, 1e-6)
    g = np.exp(-0.5 * (xs / sigma) ** 2)
    return (g / g.sum()).astype(np.float32)


def _band_matrix(size: int, radius: int, taps):
    # B[i, j] such that (x @ B)[..., j] = sum_k taps[k] * x[..., clamp(j - R + k, 0, size-1)]
    # Edge clamping is folded into the band, so no padded copy of the image is ever made.
    B = np.zeros((size, size), dtype=np.float32)
    for j in range(size):
        for k, t in enumerate(taps):
            i = min(max(j - radius + k, 0), size - 1)
            B[i, j] += float(t)
    return B


_TAPS = _gaussian_taps(BLUR_RADIUS)
# Built once at import, device-resident, bf16 (MXU-native on v5e/v6e/v7x).
# Horizontal pass:  x @ BH4   with BH4 block-diagonal so channel planes never mix.
# Vertical pass  :  BV @ tmp  with BV just (H, H) -- linear (not quadratic) in plane count.
_BH4_BF16 = jnp.asarray(
    np.kron(np.eye(LANE_PACK, dtype=np.float32), _band_matrix(W, BLUR_RADIUS, _TAPS)),
    dtype=jnp.bfloat16)                                            # (LANE_PACK*W, LANE_PACK*W)
_BV_BF16 = jnp.asarray(_band_matrix(H, BLUR_RADIUS, _TAPS).T,
                       dtype=jnp.bfloat16)                         # (H, H)


# ------------- kernel: per-image conditional Gaussian blur + uint8 encode -------------
def censor_kernel(flags_ref, x_ref, bh_ref, bv_ref, o_ref):
    # flags_ref: (N,) int32 scalar prefetch in SMEM (1 -> blur this image).
    # x_ref    : (H, CP*W) f32 lane-packed channel planes of one image (128 lanes, dense).
    # bh_ref   : (CP*W, CP*W) bf16 block-diagonal horizontal band (edge clamp folded in).
    # bv_ref   : (H, H) bf16 vertical band.
    # o_ref    : (H, CP*W) uint8 quantized output (lane-dense, unmasked stores).
    def quantize(v):
        # round-half-up then truncate toward zero == PIL-style uint8 quantization.
        q = jnp.clip(v * 255.0 + 0.5, 0.0, 255.0)
        return q.astype(jnp.int32).astype(jnp.uint8)

    flag = flags_ref[pl.program_id(0)]
    x = x_ref[...]

    @pl.when(flag > 0)
    def _():
        # Separable Gaussian blur as two bf16 MXU matmuls (f32 accumulation); edge
        # extension is baked into the band matrices, so no padded image copy exists.
        tmp = jnp.dot(x.astype(jnp.bfloat16), bh_ref[...],
                      preferred_element_type=jnp.float32)
        blur = jnp.dot(bv_ref[...], tmp.astype(jnp.bfloat16),
                       preferred_element_type=jnp.float32)
        o_ref[...] = quantize(blur)

    @pl.when(flag == 0)
    def _():
        # Non-flagged image: skip all MXU work, just quantize/encode.
        o_ref[...] = quantize(x)


def censor_encode(images, flags):
    """images: (N, C, H, W) f32 in [0,1]; flags: (N,) int32 (1 -> blur). Returns (N, C*H*W) u8."""
    Nn, Cc, Hh, Ww = images.shape
    CP = LANE_PACK

    # Lane-dense packing: channels of each image sit side-by-side along lanes ->
    # one (H, CP*W) = (32, 128) tile per grid step, fully unmasked vector stores.
    # TODO(synk): at production W (multiple of 128) skip this pack/unpack and grid per plane.
    imgs = jnp.pad(images, ((0, 0), (0, CP - Cc), (0, 0), (0, 0)))
    x_packed = imgs.transpose(0, 2, 1, 3).reshape(Nn * Hh, CP * Ww)
    flags = flags.astype(jnp.int32)

    # Bands are tiny (32 KiB + 2 KiB bf16) and their block index never changes, so the
    # pipeline does not keep re-fetching them; at production band sizes move them to
    # memory_space=pl.ANY + make_async_copy inside the pl.when(flag > 0) branch.
    # TODO(synk): at production resolutions set pltpu.CompilerParams(vmem_limit_bytes=...)
    # and re-derive block sizes against v7x's 64 MiB physical / 32 MiB scoped VMEM.
    out_packed = pl.pallas_call(
        censor_kernel,
        out_shape=jax.ShapeDtypeStruct((Nn * Hh, CP * Ww), jnp.uint8),
        grid_spec=pltpu.PrefetchScalarGridSpec(
            num_scalar_prefetch=1,
            grid=(Nn,),
            in_specs=[
                pl.BlockSpec((Hh, CP * Ww), lambda i, f: (i, 0)),
                pl.BlockSpec((CP * Ww, CP * Ww), lambda i, f: (0, 0)),
                pl.BlockSpec((Hh, Hh), lambda i, f: (0, 0)),
            ],
            out_specs=pl.BlockSpec((Hh, CP * Ww), lambda i, f: (i, 0)),
        ),
        compiler_params=pltpu.CompilerParams(
            # >= 2 grid steps -> actually shards across v7x's two TensorCores.
            dimension_semantics=("parallel",)),
    )(flags, x_packed, _BH4_BF16, _BV_BF16)

    # Undo the lane packing (cheap uint8 layout plumbing in XLA).
    out = out_packed.reshape(Nn, Hh, CP, Ww).transpose(0, 2, 1, 3)   # (N, CP, H, W)
    return out[:, :Cc].reshape(Nn, Cc * Hh * Ww)


# ------------------------- nsfw scoring (XLA glue, per review) -------------------------
def _nsfw_scores(images):
    # TODO(synk): nsfw_filter is an opaque TorchScript model; stand-in is a fixed
    # per-channel-mean linear classifier. A (2, 768) reduction is far below pallas_call
    # launch + DMA overhead, so it stays fused in the XLA graph with the resize.
    x_small = jax.image.resize(
        images, (images.shape[0], images.shape[1], RESIZE_HW, RESIZE_HW), method="bilinear")
    ch_mean = jnp.mean(x_small, axis=(2, 3))                       # (N, C)
    w = jnp.array([0.5, -0.3, 0.8], dtype=jnp.float32)
    return jax.nn.sigmoid(ch_mean @ w + 0.1)[:, None]              # (N, 1)


# ------------------------- end-to-end "forward" -------------------------
@jax.jit
def diffusion_module_forward(prompts):
    # TODO(synk): the real module runs a full Stable Diffusion pipeline loaded from
    # 'sd_model.pt'; we synthesize deterministic "generated images" seeded from the prompts.
    prompt_seed = jnp.sum(prompts.astype(jnp.uint32))
    img_key = jax.random.fold_in(jax.random.PRNGKey(0), prompt_seed)
    images = jax.random.uniform(img_key, (N, C, H, W), dtype=jnp.float32)

    scores = _nsfw_scores(images)                                   # (N, 1)
    flags = (scores[:, 0] > NSFW_THRESHOLD).astype(jnp.int32)       # per-image censorship flag

    # TODO(synk): WEBP encoding + variable-length byte-buffer padding have no tensor
    # equivalent; the kernel emits fixed-length uint8 buffers (quantized pixels) instead.
    stacked = censor_encode(images, flags)                          # (N, C*H*W) uint8
    return stacked, scores


if __name__ == "__main__":
    key = jax.random.PRNGKey(0)
    prompts = jax.random.randint(key, (N, PROMPT_LEN), 0, 256, dtype=jnp.int32).astype(jnp.uint8)

    stacked_images, nsfw = diffusion_module_forward(prompts)
    jax.block_until_ready(stacked_images)
    jax.block_until_ready(nsfw)

    assert stacked_images.shape == (N, C * H * W)
    assert stacked_images.dtype == jnp.uint8
    assert nsfw.shape == (N, 1)
    print("KERNEL_OK")
</pallas_src>

<mosaic_0001>
module attributes {stable_mosaic.version = 11 : i64} {
  func.func @censor_kernel(%arg0: i32, %arg1: memref<2xi32, #tpu.memory_space<smem>>, %arg2: memref<32x128xf32, #tpu.memory_space<vmem>>, %arg3: memref<128x128xbf16, #tpu.memory_space<vmem>>, %arg4: memref<32x32xbf16, #tpu.memory_space<vmem>>, %arg5: memref<32x128xi8, #tpu.memory_space<vmem>>) attributes {dimension_semantics = [#tpu.dimension_semantics<parallel>], iteration_bounds = array<i64: 2>, scalar_prefetch = 1 : i64, scratch_operands = 0 : i64, tpu.core_type = #tpu.core_type<tc>, window_params = [{transform_indices = @transform_0, window_bounds = array<i64: 32, 128>}, {pipeline_mode = #tpu.pipeline_mode<synchronous>, transform_indices = @transform_1, window_bounds = array<i64: 128, 128>}, {pipeline_mode = #tpu.pipeline_mode<synchronous>, transform_indices = @transform_2, window_bounds = array<i64: 32, 32>}, {transform_indices = @transform_3, window_bounds = array<i64: 32, 128>}]} {
    %0 = arith.index_cast %arg0 : i32 to index
    %1 = memref.load %arg1[%0] : memref<2xi32, #tpu.memory_space<smem>>
    %c0 = arith.constant 0 : index
    %c0_0 = arith.constant 0 : index
    %2 = vector.load %arg2[%c0, %c0_0] : memref<32x128xf32, #tpu.memory_space<vmem>>, vector<32x128xf32>
    %c0_i32 = arith.constant 0 : i32
    %3 = arith.cmpi sgt, %1, %c0_i32 : i32
    %4 = arith.extui %3 : i1 to i32
    %c0_i32_1 = arith.constant 0 : i32
    %5 = arith.cmpi ne, %4, %c0_i32_1 : i32
    scf.if %5 {
      %9 = arith.truncf %2 : vector<32x128xf32> to vector<32x128xbf16>
      %c0_4 = arith.constant 0 : index
      %c0_5 = arith.constant 0 : index
      %10 = vector.load %arg3[%c0_4, %c0_5] : memref<128x128xbf16, #tpu.memory_space<vmem>>, vector<128x128xbf16>
      %cst = arith.constant dense<0.000000e+00> : vector<32x128xf32>
      %11 = tpu.matmul %9, %10, %cst {dimension_numbers = #tpu.dot_dimension_numbers<[1], [0], [0], [1], [0, 0, 1, 1], [], []>} : vector<32x128xbf16>, vector<128x128xbf16>, vector<32x128xf32> -> vector<32x128xf32>
      %c0_6 = arith.constant 0 : index
      %c0_7 = arith.constant 0 : index
      %12 = vector.load %arg4[%c0_6, %c0_7] : memref<32x32xbf16, #tpu.memory_space<vmem>>, vector<32x32xbf16>
      %13 = arith.truncf %11 : vector<32x128xf32> to vector<32x128xbf16>
      %cst_8 = arith.constant dense<0.000000e+00> : vector<32x128xf32>
      %14 = tpu.matmul %12, %13, %cst_8 {dimension_numbers = #tpu.dot_dimension_numbers<[1], [0], [0], [1], [0, 0, 1, 1], [], []>} : vector<32x32xbf16>, vector<32x128xbf16>, vector<32x128xf32> -> vector<32x128xf32>
      %cst_9 = arith.constant 2.550000e+02 : f32
      %15 = vector.broadcast %cst_9 : f32 to vector<32x128xf32>
      %16 = arith.mulf %14, %15 : vector<32x128xf32>
      %cst_10 = arith.constant 5.000000e-01 : f32
      %17 = vector.broadcast %cst_10 : f32 to vector<32x128xf32>
      %18 = arith.addf %16, %17 : vector<32x128xf32>
      %cst_11 = arith.constant 0.000000e+00 : f32
      %cst_12 = arith.constant 2.550000e+02 : f32
      %19 = vector.broadcast %cst_11 : f32 to vector<32x128xf32>
      %20 = arith.maximumf %19, %18 : vector<32x128xf32>
      %21 = vector.broadcast %cst_12 : f32 to vector<32x128xf32>
      %22 = arith.minimumf %21, %20 : vector<32x128xf32>
      %23 = arith.fptosi %22 : vector<32x128xf32> to vector<32x128xi32>
      %24 = arith.trunci %23 : vector<32x128xi32> to vector<32x128xi8>
      %c0_13 = arith.constant 0 : index
      %c0_14 = arith.constant 0 : index
      %25 = vector.load %arg5[%c0_13, %c0_14] : memref<32x128xi8, #tpu.memory_space<vmem>>, vector<32x128xi8>
      tpu.vector_store %arg5[%c0_13, %c0_14], %24 {strides = array<i32>} : memref<32x128xi8, #tpu.memory_space<vmem>>, vector<32x128xi8>,
    } else {
    }
    %c0_i32_2 = arith.constant 0 : i32
    %6 = arith.cmpi eq, %1, %c0_i32_2 : i32
    %7 = arith.extui %6 : i1 to i32
    %c0_i32_3 = arith.constant 0 : i32
    %8 = arith.cmpi ne, %7, %c0_i32_3 : i32
    scf.if %8 {
      %cst = arith.constant 2.550000e+02 : f32
      %9 = vector.broadcast %cst : f32 to vector<32x128xf32>
      %10 = arith.mulf %2, %9 : vector<32x128xf32>
      %cst_4 = arith.constant 5.000000e-01 : f32
      %11 = vector.broadcast %cst_4 : f32 to vector<32x128xf32>
      %12 = arith.addf %10, %11 : vector<32x128xf32>
      %cst_5 = arith.constant 0.000000e+00 : f32
      %cst_6 = arith.constant 2.550000e+02 : f32
      %13 = vector.broadcast %cst_5 : f32 to vector<32x128xf32>
      %14 = arith.maximumf %13, %12 : vector<32x128xf32>
      %15 = vector.broadcast %cst_6 : f32 to vector<32x128xf32>
      %16 = arith.minimumf %15, %14 : vector<32x128xf32>
      %17 = arith.fptosi %16 : vector<32x128xf32> to vector<32x128xi32>
      %18 = arith.trunci %17 : vector<32x128xi32> to vector<32x128xi8>
      %c0_7 = arith.constant 0 : index
      %c0_8 = arith.constant 0 : index
      %19 = vector.load %arg5[%c0_7, %c0_8] : memref<32x128xi8, #tpu.memory_space<vmem>>, vector<32x128xi8>
      tpu.vector_store %arg5[%c0_7, %c0_8], %18 {strides = array<i32>} : memref<32x128xi8, #tpu.memory_space<vmem>>, vector<32x128xi8>,
    } else {
    }
    return
  }
  func.func @transform_0(%arg0: i32, %arg1: memref<2xi32, #tpu.memory_space<smem>>) -> (i32, i32) {
    %c0_i32 = arith.constant 0 : i32
    %c0_i32_0 = arith.constant 0 : i32
    return %arg0, %c0_i32 : i32, i32
  }
  func.func @transform_1(%arg0: i32, %arg1: memref<2xi32, #tpu.memory_space<smem>>) -> (i32, i32) {
    %c0_i32 = arith.constant 0 : i32
    %c0_i32_0 = arith.constant 0 : i32
    %c0_i32_1 = arith.constant 0 : i32
    return %c0_i32, %c0_i32_0 : i32, i32
  }
  func.func @transform_2(%arg0: i32, %arg1: memref<2xi32, #tpu.memory_space<smem>>) -> (i32, i32) {
    %c0_i32 = arith.constant 0 : i32
    %c0_i32_0 = arith.constant 0 : i32
    %c0_i32_1 = arith.constant 0 : i32
    return %c0_i32, %c0_i32_0 : i32, i32
  }
  func.func @transform_3(%arg0: i32, %arg1: memref<2xi32, #tpu.memory_space<smem>>) -> (i32, i32) {
    %c0_i32 = arith.constant 0 : i32
    %c0_i32_0 = arith.constant 0 : i32
    return %arg0, %c0_i32 : i32, i32
  }
}

</mosaic_0001>

<bundles_post_ra>
// kernel: diffusion_module_forward.3
= control target key start
LH: loop header
LB: loop body
LE: loop exit
PB: predicated region body
PF: predicated region fallthrough
CT: control target
= control target key end

     0   :  { %s732_s0 = inlined_call_operand.vmem [shape: s32[2], index: 0, kind: input, shape index: {}]   ;;  %s733_s1 = inlined_call_operand.vmem [shape: f32[64,128], index: 1, kind: input, shape index: {}]   ;;  %s734_s2 = inlined_call_operand.vmem [shape: bf16[128,128], index: 2, kind: input, shape index: {}]   ;;  %s735_s3 = inlined_call_operand.vmem [shape: bf16[32,32], index: 3, kind: input, shape index: {}]   ;;  %s736_s4 = inlined_call_operand.vmem [shape: u8[64,128], index: 4, kind: output, shape index: {}]  }
   0x1   :  { %s9_s17 = sshll.u32 %s732_s0, 4  ;;  %s10_s17 = int_to_ptr.vmem [resolvable:$true] %s9_s17 }
   0x2   :  { %s604_s18 = scalar_lea.vmem %s10_s17, 16  ;;  %p609_p1 = scmp.lt.s32.totalorder %s10_s17, %s10_s17 }
   0x3   :  { %p605_p0 = scmp.ne.s32.totalorder %s10_s17, %s604_s18  ;;  %p610_p2 = scmp.lt.s32.totalorder %s604_s18, %s604_s18 }
   0x5   :  { %p611_p3 = por %p610_p2, %p609_p1 }
   0x7   :  { %p612_p4 = pnand %p611_p3, %p605_p0 }
   0x9   :  { %615 = shalt.err (!%p612_p4)  }
   0xa   :  { %s626_s19 = smov [#allocation3]  }
   0xb   :  { %12 = dma.vmem_to_smem %s10_s17, 16, %s626_s19, [#allocation2] }
   0xc   :  { %620 = dma.done.wait [#allocation2], 16 }
   0xd   :  { %621 = vsyncadd [#allocation2], 4294967280 }
   0xe   :  { %14 = sfence }
   0xf   :  { %s655_s20 = smov 0  }
  0x10 LB: > { %s502_s0 = sadd.s32 4294967295, %s624_s20   ;;  %p506_p5 = scmp.ge.s32.totalorder %s624_s20, 1  ;;  %s624_s20 = sphi %s655_s20, %s20_s20  }
  0x11   : > { %p145_p6 = scmp.lt.s32.totalorder %s624_s20, 3 }
  0x13   : > { %p146_p7 = pnand %p506_p5, %p145_p6 }
  0x14   : > { %s507_s21 = sshll.u32 (!%p146_p7), %s502_s0, 2  ;;  %s663_s22 = sld [smem:[#allocation3 + %s502_s0]] (!%p146_p7) }
  0x15   : > { %149 = sbr.rel (%p146_p7) target bundleno = 515 (0x203), region = 32  ;;  %p170_p8 = scmp.lt.s32.totalorder (!%p146_p7), %s507_s21, 7 }
  0x1a   : > { %s738_s21 = smov (!%p170_p8, %s507_s21), 7  ;;  %p511_p9 = scmp.le.s32.totalorder %s663_s22, 0 }
  0x1b   : > { %s508_s23 = sshll.u32 %s738_s21, 3  ;;  %s510_s24 = sshll.u32 %s738_s21, 1 }
  0x1c   : > { %s173_s27 = scalar_lea.vmem %s733_s1, %s508_s23  ;;  %s671_s30 = scalar_lea.vmem %s736_s4, %s510_s24 }
  0x1d   : > { %v673_v0 = vld [vmem:[%s173_s27] sm:$0xff]  ;;  %v675_v1 = vld [vmem:[%s173_s27 + $0x8] sm:$0xff]  ;;  %v677_v2 = vld [vmem:[%s173_s27 + $0x10] sm:$0xff]  ;;  %190 = sbr.rel (%p511_p9) target bundleno = 490 (0x1ea), region = 36 }
  0x1e   : > { %v679_v3 = vld [vmem:[%s173_s27 + $0x18] sm:$0xff] }
  0x22   : > { %v594_v4 = vld [vmem:[%s734_s2 + $0x38] sm:$0xff]   ;;  %v191_v5 = vpack.c.bf16 %v675_v1, %v673_v0  ;;  %v595_v6 = vld [vmem:[%s734_s2 + $0x30] sm:$0xff]   ;;  %v596_v7 = vld [vmem:[%s734_s2 + $0x28] sm:$0xff]   ;;  %v192_v13 = vpack.c.bf16 %v679_v3, %v677_v2  ;;  %vm322_vm0 = vcmask 261120  }
  0x23   : > { %541 = vmatprep.subr.bf16.mxu0 %v594_v4  ;;  %v597_v8 = vld [vmem:[%s734_s2 + $0x20] sm:$0xff]   ;;  %v598_v9 = vld [vmem:[%s734_s2 + $0x18] sm:$0xff]   ;;  %v599_v10 = vld [vmem:[%s734_s2 + $0x10] sm:$0xff]  }
  0x24   : > { %557 = vmatprep.mubr.bf16.mxu0 %v191_v5  ;;  %542 = vmatpush3.bf16.msra.mxu0 %v594_v4  ;;  %v600_v11 = vld [vmem:[%s734_s2 + $0x8] sm:$0xff]   ;;  %v601_v12 = vld [vmem:[%s734_s2] sm:$0xff]  }
  0x25   : > { %543 = vmatprep.subr.bf16.mxu0 %v595_v6  ;;  %v602_v14 = vld [vmem:[%s735_s3] sm:$0xff]   ;;  %v603_v21 = vld [vmem:[%s735_s3 + $0x8] sm:$0xff]  }
  0x26   : > { %565 = vmatprep.mubr.msk.bf16.mxu1 %vm322_vm0, %v602_v14 }
  0x28   : > { %544 = vmatpush3.bf16.msra.mxu0 %v595_v6 }
  0x29   : > { %545 = vmatprep.subr.bf16.mxu0 %v596_v7 }
  0x2c   : > { %546 = vmatpush3.bf16.msra.mxu0 %v596_v7 }
  0x2d   : > { %547 = vmatprep.subr.bf16.mxu0 %v597_v8 }
  0x30   : > { %548 = vmatpush3.bf16.msra.mxu0 %v597_v8 }
  0x31   : > { %549 = vmatprep.subr.bf16.mxu0 %v598_v9 }
  0x34   : > { %550 = vmatpush3.bf16.msra.mxu0 %v598_v9 }
  0x35   : > { %551 = vmatprep.subr.bf16.mxu0 %v599_v10 }
  0x38   : > { %552 = vmatpush3.bf16.msra.mxu0 %v599_v10 }
  0x39   : > { %553 = vmatprep.subr.bf16.mxu0 %v600_v11 }
  0x3c   : > { %554 = vmatpush3.bf16.msra.mxu0 %v600_v11 }
  0x3d   : > { %555 = vmatprep.subr.bf16.mxu0 %v601_v12 }
  0x40   : > { %556 = vmatpush3.bf16.msra.mxu0 %v601_v12 }
  0x43   : > { %558 = vmatmul.mubr.bf16.vlgmr.msra.gmra.mxu0 %v192_v13 }
 0x103   : > { %v559_v15 = vpop.f32.mrf.mxu0 }
 0x105   : > { %v291_v16 = vpop.f32.mrf.mxu0 }
 0x107   : > { %v560_v17 = vpop.f32.mrf.mxu0 }
 0x108   : > { %v311_v18 = vpack.c.bf16 %v560_v17, %v559_v15 }
 0x109   : > { %v294_v19 = vpop.f32.mrf.mxu0 }
 0x10a   : > { %v310_v20 = vpack.c.bf16 %v294_v19, %v291_v16  ;;  %561 = vmatprep.subr.bf16.mxu1 %v311_v18 }
 0x10b   : > { %562 = vmatpush3.bf16.msra.mxu1 %v311_v18 }
 0x10c   : > { %563 = vmatprep.subr.bf16.mxu1 %v310_v20 }
 0x10f   : > { %564 = vmatpush3.bf16.msra.mxu1 %v310_v20 }
 0x112   : > { %566 = vmatmul.mubr.msk.bf16.vlgmr.msra.gmra.mxu1 %vm322_vm0, %v603_v21 }
 0x1d2   : > { %v567_v22 = vpop.f32.mrf.mxu1 }
 0x1d3   : > { %v380_v23 = vmul.f32 255.0, %v567_v22 }
 0x1d4   : > { %v363_v24 = vpop.f32.mrf.mxu1 }
 0x1d5   : > { %v384_v25 = vadd.f32 0.5, %v380_v23  ;;  %v378_v26 = vmul.f32 255.0, %v363_v24 }
 0x1d6   : > { %v568_v27 = vpop.f32.mrf.mxu1 }
 0x1d7   : > { %v388_v28 = vmax.f32 %v384_v25, 0.0  ;;  %v382_v29 = vadd.f32 0.5, %v378_v26  ;;  %v381_v30 = vmul.f32 255.0, %v568_v27 }
 0x1d8   : > { %v366_v31 = vpop.f32.mrf.mxu1 }
 0x1d9   : > { %v392_v32 = vmin.f32 %v388_v28, 255.0  ;;  %v386_v33 = vmax.f32 %v382_v29, 0.0  ;;  %v385_v34 = vadd.f32 0.5, %v381_v30  ;;  %v379_v35 = vmul.f32 255.0, %v366_v31 }
 0x1db   : > { %v390_v36 = vmin.f32 %v386_v33, 255.0  ;;  %v389_v37 = vmax.f32 %v385_v34, 0.0  ;;  %v383_v38 = vadd.f32 0.5, %v379_v35  ;;  %v573_v39 = vtrunc.f32 %v392_v32 }
 0x1dd   : > { %v569_v40 = vtrunc.f32 %v390_v36  ;;  %v393_v41 = vmin.f32 %v389_v37, 255.0  ;;  %v387_v42 = vmax.f32 %v383_v38, 0.0  ;;  %v574_v46 = vcvt.f32.s32 %v573_v39 }
 0x1df   : > { %v570_v43 = vcvt.f32.s32 %v569_v40  ;;  %v575_v44 = vtrunc.f32 %v393_v41  ;;  %v391_v45 = vmin.f32 %v387_v42, 255.0  ;;  %v402_v52 = vpack.c.b16 %v574_v46, %v574_v46 }
 0x1e1   : > { %v398_v47 = vpack.c.b16 %v570_v43, %v570_v43  ;;  %v576_v48 = vcvt.f32.s32 %v575_v44  ;;  %v571_v49 = vtrunc.f32 %v391_v45  ;;  %v403_v56 = vpack.c.b8 %v402_v52, %v402_v52 }
 0x1e3   : > { %v399_v50 = vpack.c.b8 %v398_v47, %v398_v47  ;;  %v572_v51 = vcvt.f32.s32 %v571_v49  ;;  %v404_v53 = vpack.c.b16 %v576_v48, %v576_v48  ;;  %408 = vst [vmem:[%s671_s30 + $0x4] sm:$0x3] %v403_v56 }
 0x1e5   : > { %406 = vst [vmem:[%s671_s30] sm:$0x3] %v399_v50  ;;  %v400_v54 = vpack.c.b16 %v572_v51, %v572_v51  ;;  %v405_v57 = vpack.c.b8 %v404_v53, %v404_v53 }
 0x1e7   : > { %v401_v55 = vpack.c.b8 %v400_v54, %v400_v54  ;;  %409 = vst [vmem:[%s671_s30 + $0x6] sm:$0x3] %v405_v57 }
 0x1e9   : > { %407 = vst [vmem:[%s671_s30 + $0x2] sm:$0x3] %v401_v55 }
 0x1ea PF: > { %p524_p10 = scmp.ne.s32.totalorder %s663_s22, 0 }
 0x1ec   : > { %413 = sbr.rel (%p524_p10) target bundleno = 515 (0x203), region = 40 }
 0x1f1   : > { %v414_v58 = vmul.f32 255.0, %v673_v0  ;;  %v415_v59 = vmul.f32 255.0, %v675_v1  ;;  %v416_v60 = vmul.f32 255.0, %v677_v2  ;;  %v417_v61 = vmul.f32 255.0, %v679_v3 }
 0x1f3   : > { %v418_v62 = vadd.f32 0.5, %v414_v58  ;;  %v419_v63 = vadd.f32 0.5, %v415_v59  ;;  %v420_v4 = vadd.f32 0.5, %v416_v60  ;;  %v421_v5 = vadd.f32 0.5, %v417_v61 }
 0x1f5   : > { %v422_v6 = vmax.f32 %v418_v62, 0.0  ;;  %v423_v7 = vmax.f32 %v419_v63, 0.0  ;;  %v424_v8 = vmax.f32 %v420_v4, 0.0  ;;  %v425_v9 = vmax.f32 %v421_v5, 0.0 }
 0x1f7   : > { %v426_v10 = vmin.f32 %v422_v6, 255.0  ;;  %v427_v11 = vmin.f32 %v423_v7, 255.0  ;;  %v428_v12 = vmin.f32 %v424_v8, 255.0  ;;  %v429_v13 = vmin.f32 %v425_v9, 255.0 }
 0x1f9   : > { %v577_v14 = vtrunc.f32 %v426_v10  ;;  %v579_v0 = vtrunc.f32 %v427_v11  ;;  %v581_v1 = vtrunc.f32 %v428_v12  ;;  %v583_v2 = vtrunc.f32 %v429_v13 }
 0x1fb   : > { %v578_v3 = vcvt.f32.s32 %v577_v14  ;;  %v580_v15 = vcvt.f32.s32 %v579_v0  ;;  %v582_v16 = vcvt.f32.s32 %v581_v1  ;;  %v584_v17 = vcvt.f32.s32 %v583_v2 }
 0x1fd   : > { %v434_v18 = vpack.c.b16 %v578_v3, %v578_v3  ;;  %v436_v19 = vpack.c.b16 %v580_v15, %v580_v15  ;;  %v438_v20 = vpack.c.b16 %v582_v16, %v582_v16  ;;  %v440_v21 = vpack.c.b16 %v584_v17, %v584_v17 }
 0x1ff   : > { %v435_v22 = vpack.c.b8 %v434_v18, %v434_v18  ;;  %v437_v23 = vpack.c.b8 %v436_v19, %v436_v19  ;;  %v439_v24 = vpack.c.b8 %v438_v20, %v438_v20  ;;  %v441_v25 = vpack.c.b8 %v440_v21, %v440_v21 }
 0x201   : > { %442 = vst [vmem:[%s671_s30] sm:$0x3] %v435_v22  ;;  %443 = vst [vmem:[%s671_s30 + $0x2] sm:$0x3] %v437_v23 }
 0x202   : > { %444 = vst [vmem:[%s671_s30 + $0x4] sm:$0x3] %v439_v24  ;;  %445 = vst [vmem:[%s671_s30 + $0x6] sm:$0x3] %v441_v25 }
 0x203 PF: > { %s20_s20 = sadd.s32 1, %s624_s20  }
 0x204   : > { %p17_p11 = scmp.ge.s32.totalorder %s20_s20, 4  }
 0x206   :  { %19 = sbr.rel (!%p17_p11) target bundleno = 16 (0x10), region = 70 }

</bundles_post_ra>
